<compile_context>
chip_gen: v5e
topology: v5e:2x2
jax: 0.10.0
libtpu: 0.0.40
codegen_flags: <defaults>
</compile_context>

<pallas_src>
import functools

import jax
import jax.numpy as jnp
from jax.experimental import pallas as pl
from jax.experimental.pallas import tpu as pltpu

LP = 128     # lane width; each batch element owns one 128-lane time segment
_EPS = 1e-5  # BatchNorm1d eps


def _round_up(n, m):
    return -(-n // m) * m


# ---------------------------------------------------------------------------
# Single fused kernel: all Conv1d + BN + ReLU (+ Dropout=identity) layers
# ---------------------------------------------------------------------------
def _build_fused_tcn_kernel(n_lanes, layer_cfgs):
    def kernel(x_ref, p_ref, o_ref):
        # per-segment time position of every lane (built once, reused per layer)
        lane_pos = jnp.bitwise_and(
            jax.lax.broadcasted_iota(jnp.int32, (1, n_lanes), 1), LP - 1)

        cur = x_ref[...]                       # (Cin0_pad, B*128); tails are 0
        for cfg in layer_cfgs:
            K, d, pad = cfg["K"], cfg["dilation"], cfg["pad"]
            cin, cout, l_out = cfg["cin"], cfg["cout"], cfg["l_out"]
            w_row, ss_row, cpad = cfg["w_row"], cfg["ss_row"], cfg["cout_pad"]

            # Dilated conv: K register-built taps, each contracted on the MXU.
            # tap_j[c, t] = cur[c, t - (pad - j*d)], zeros shifted in because
            # every lane >= previous valid length is kept at exactly 0.
            acc = None
            for j in range(K):                  # static unrolled taps
                shift = pad - j * d             # static, >= 0
                tap = pltpu.roll(cur, shift, axis=1) if shift else cur
                r0 = w_row + j * cpad
                w_j = p_ref[r0:r0 + cout, 0:cin]            # (Cout, Cin)
                part = jnp.dot(w_j, tap,
                               preferred_element_type=jnp.float32)
                acc = part if acc is None else acc + part   # (Cout, B*128)

            # folded BatchNorm (eval) + conv bias + ReLU; Dropout = identity
            scale = p_ref[ss_row:ss_row + cout, 0:1]        # (Cout, 1)
            shift_bn = p_ref[ss_row:ss_row + cout, 1:2]     # (Cout, 1)
            cur = jnp.maximum(acc * scale + shift_bn, 0.0)
            # re-zero per-segment tail lanes: this IS the conv zero padding for
            # the next layer and keeps cross-segment roll wrap-around at zero.
            cur = jnp.where(lane_pos < l_out, cur, 0.0)

        o_ref[...] = cur                        # full-lane, unmasked store

    return kernel


# ---------------------------------------------------------------------------
# Parameter packing: one lane-dense f32 array holding every layer's conv
# weights and folded BN scale/shift at static, 8-sublane-aligned row offsets.
# ---------------------------------------------------------------------------
def _pack_params(params, cin0, l_in):
    cfgs, blocks, row = [], [], 0
    cin_k = _round_up(max(cin0, 8), 8)     # pad input channels to a sublane mult
    cur_len = l_in
    for layer in params["layers"]:
        K, d = int(layer["K"]), int(layer["dilation"])
        pad = (K - 1) * d
        w = layer["w"]                      # torch layout (Cout, Cin, K)
        cout, cin = int(w.shape[0]), int(w.shape[1])
        l_out = cur_len + pad               # PyTorch Conv1d out length (stride 1)
        cpad = _round_up(cout, 8)
        assert cin <= LP and cin_k <= LP

        w_row = row
        for j in range(K):
            blk = jnp.zeros((cpad, LP), jnp.float32)
            blk = blk.at[:cout, :cin].set(w[:, :, j])
            blocks.append(blk)
            row += cpad
        ss_row = row
        ss = jnp.zeros((cpad, LP), jnp.float32)
        ss = ss.at[:cout, 0].set(layer["scale"])
        ss = ss.at[:cout, 1].set(layer["shift"])
        blocks.append(ss)
        row += cpad

        cfgs.append(dict(K=K, dilation=d, pad=pad, cin=cin_k, cout=cout,
                         cout_pad=cpad, l_out=l_out, w_row=w_row, ss_row=ss_row))
        cin_k, cur_len = cout, l_out

    return jnp.concatenate(blocks, axis=0), cfgs


def tcn_forward(x, params):
    """Whole TCN forward (inference mode) as a single fused Pallas kernel."""
    x = x.astype(jnp.float32)
    B, cin0, l_in = x.shape
    assert l_in <= LP, "sequence length must fit in the 128-lane time segment"

    packed, cfgs = _pack_params(params, cin0, l_in)
    for cfg in cfgs:
        # per-layer guard: padded output length must stay within one segment
        assert cfg["l_out"] <= LP, "padded sequence length exceeds 128 lanes"

    cin_k = cfgs[0]["cin"]
    # lane-dense kernel layout: (C, B*128), time on lanes, zero-padded tails
    x_p = jnp.pad(x, ((0, 0), (0, cin_k - cin0), (0, LP - l_in)))
    x_k = jnp.transpose(x_p, (1, 0, 2)).reshape(cin_k, B * LP)

    cout_last, l_final = cfgs[-1]["cout"], cfgs[-1]["l_out"]
    kernel = _build_fused_tcn_kernel(B * LP, cfgs)
    out = pl.pallas_call(
        kernel,
        out_shape=jax.ShapeDtypeStruct((cout_last, B * LP), jnp.float32),
        in_specs=[pl.BlockSpec(memory_space=pltpu.MemorySpace.VMEM)] * 2,
        out_specs=pl.BlockSpec(memory_space=pltpu.MemorySpace.VMEM),
    )(x_k, packed)
    # crop / relayout back to the PyTorch (B, C, L) convention in XLA glue so
    # the kernel's stores stay full-lane and unmasked.
    return jnp.transpose(out.reshape(cout_last, B, LP), (1, 0, 2))[:, :, :l_final]


# ---------------------------------------------------------------------------
# Synthetic parameters (PyTorch layouts); BN eval-mode folded into scale/shift
# ---------------------------------------------------------------------------
def init_params(key, num_inputs, num_channels, kernel_size=2):
    params = {"layers": []}
    cin = num_inputs
    for i, cout in enumerate(num_channels):
        key, kw, kb, kg, kbe, km, kv = jax.random.split(key, 7)
        w = 0.3 * jax.random.normal(kw, (cout, cin, kernel_size), jnp.float32)
        b = 0.1 * jax.random.normal(kb, (cout,), jnp.float32)
        gamma = 1.0 + 0.1 * jax.random.normal(kg, (cout,), jnp.float32)
        beta = 0.1 * jax.random.normal(kbe, (cout,), jnp.float32)
        mean = 0.1 * jax.random.normal(km, (cout,), jnp.float32)
        var = jax.random.uniform(kv, (cout,), jnp.float32, 0.5, 1.5)
        scale = gamma / jnp.sqrt(var + _EPS)
        shift = (b - mean) * scale + beta      # conv bias folded into BN shift
        params["layers"].append(dict(
            K=kernel_size, dilation=2 ** i,
            w=w, scale=scale, shift=shift,          # kernel-side (packed later)
            b=b, gamma=gamma, beta=beta, mean=mean, var=var))  # reference-side
        cin = cout
    return params


# ---------------------------------------------------------------------------
# Pure-JAX (XLA) reference for correctness checking
# ---------------------------------------------------------------------------
def tcn_reference(x, params):
    h = x.astype(jnp.float32)
    for layer in params["layers"]:
        d, K = layer["dilation"], layer["K"]
        pad = (K - 1) * d
        h = jax.lax.conv_general_dilated(
            h, layer["w"], window_strides=(1,), padding=[(pad, pad)],
            rhs_dilation=(d,), dimension_numbers=("NCH", "OIH", "NCH"),
            precision=jax.lax.Precision.HIGHEST)
        h = h + layer["b"][None, :, None]
        h = ((h - layer["mean"][None, :, None])
             / jnp.sqrt(layer["var"][None, :, None] + _EPS)
             * layer["gamma"][None, :, None] + layer["beta"][None, :, None])
        h = jnp.maximum(h, 0.0)            # ReLU; Dropout = identity (eval)
    return h


if __name__ == "__main__":
    num_inputs = 4
    num_channels = [8, 16]
    kernel_size = 2
    B, L = 4, 50

    key = jax.random.PRNGKey(0)
    kp, kx = jax.random.split(key)
    params = init_params(kp, num_inputs, num_channels, kernel_size)
    x = jax.random.normal(kx, (B, num_inputs, L), jnp.float32)

    fwd = jax.jit(functools.partial(tcn_forward, params=params))
    out = jax.block_until_ready(fwd(x))

    l_final = L + sum((kernel_size - 1) * (2 ** i) for i in range(len(num_channels)))
    assert out.shape == (B, num_channels[-1], l_final), out.shape
    assert bool(jnp.all(jnp.isfinite(out)))

    ref = tcn_reference(x, params)
    max_err = float(jnp.max(jnp.abs(out - ref)))
    assert max_err < 1e-3, f"mismatch vs XLA reference, max abs err = {max_err}"

    print("KERNEL_OK")
</pallas_src>

<mosaic_0001>
module attributes {stable_mosaic.version = 11 : i64} {
  func.func @kernel(%arg0: memref<8x512xf32, #tpu.memory_space<vmem>>, %arg1: memref<72x128xf32, #tpu.memory_space<vmem>>, %arg2: memref<16x512xf32, #tpu.memory_space<vmem>>) attributes {dimension_semantics = [], scalar_prefetch = 0 : i64, scratch_operands = 0 : i64, tpu.core_type = #tpu.core_type<tc>} {
    %0 = tpu.iota {dimensions = array<i32: 1>} : vector<1x512xi32>
    %c127_i32 = arith.constant 127 : i32
    %1 = vector.broadcast %c127_i32 : i32 to vector<1x512xi32>
    %2 = arith.andi %0, %1 : vector<1x512xi32>
    %c0 = arith.constant 0 : index
    %c0_0 = arith.constant 0 : index
    %3 = vector.load %arg0[%c0, %c0_0] : memref<8x512xf32, #tpu.memory_space<vmem>>, vector<8x512xf32>
    %c1_i32 = arith.constant 1 : i32
    %4 = tpu.dynamic_rotate %3 by %c1_i32 dim 1 : vector<8x512xf32>, i32 -> vector<8x512xf32>
    %c0_1 = arith.constant 0 : index
    %c0_2 = arith.constant 0 : index
    %5 = vector.load %arg1[%c0_1, %c0_2] : memref<72x128xf32, #tpu.memory_space<vmem>>, vector<8x8xf32>
    %cst = arith.constant dense<0.000000e+00> : vector<8x512xf32>
    %6 = tpu.matmul %5, %4, %cst {dimension_numbers = #tpu.dot_dimension_numbers<[1], [0], [0], [1], [0, 0, 1, 1], [], []>} : vector<8x8xf32>, vector<8x512xf32>, vector<8x512xf32> -> vector<8x512xf32>
    %c8 = arith.constant 8 : index
    %c0_3 = arith.constant 0 : index
    %7 = vector.load %arg1[%c8, %c0_3] : memref<72x128xf32, #tpu.memory_space<vmem>>, vector<8x8xf32>
    %cst_4 = arith.constant dense<0.000000e+00> : vector<8x512xf32>
    %8 = tpu.matmul %7, %3, %cst_4 {dimension_numbers = #tpu.dot_dimension_numbers<[1], [0], [0], [1], [0, 0, 1, 1], [], []>} : vector<8x8xf32>, vector<8x512xf32>, vector<8x512xf32> -> vector<8x512xf32>
    %9 = arith.addf %6, %8 : vector<8x512xf32>
    %c16 = arith.constant 16 : index
    %c0_5 = arith.constant 0 : index
    %10 = vector.load %arg1[%c16, %c0_5] : memref<72x128xf32, #tpu.memory_space<vmem>>, vector<8x1xf32>
    %c16_6 = arith.constant 16 : index
    %c1 = arith.constant 1 : index
    %11 = vector.load %arg1[%c16_6, %c1] : memref<72x128xf32, #tpu.memory_space<vmem>>, vector<8x1xf32>
    %12 = vector.broadcast %10 : vector<8x1xf32> to vector<8x512xf32>
    %13 = arith.mulf %9, %12 : vector<8x512xf32>
    %14 = vector.broadcast %11 : vector<8x1xf32> to vector<8x512xf32>
    %15 = arith.addf %13, %14 : vector<8x512xf32>
    %cst_7 = arith.constant 0.000000e+00 : f32
    %16 = vector.broadcast %cst_7 : f32 to vector<8x512xf32>
    %17 = arith.maximumf %15, %16 : vector<8x512xf32>
    %c51_i32 = arith.constant 51 : i32
    %18 = vector.broadcast %c51_i32 : i32 to vector<1x512xi32>
    %19 = arith.cmpi slt, %2, %18 : vector<1x512xi32>
    %cst_8 = arith.constant 0.000000e+00 : f32
    %20 = vector.shape_cast %19 : vector<1x512xi1> to vector<1x512xi1>
    %21 = vector.broadcast %20 : vector<1x512xi1> to vector<8x512xi1>
    %22 = vector.broadcast %cst_8 : f32 to vector<8x512xf32>
    %23 = arith.select %21, %17, %22 : vector<8x512xi1>, vector<8x512xf32>
    %c2_i32 = arith.constant 2 : i32
    %24 = tpu.dynamic_rotate %23 by %c2_i32 dim 1 : vector<8x512xf32>, i32 -> vector<8x512xf32>
    %c24 = arith.constant 24 : index
    %c0_9 = arith.constant 0 : index
    %25 = vector.load %arg1[%c24, %c0_9] : memref<72x128xf32, #tpu.memory_space<vmem>>, vector<16x8xf32>
    %cst_10 = arith.constant dense<0.000000e+00> : vector<16x512xf32>
    %26 = tpu.matmul %25, %24, %cst_10 {dimension_numbers = #tpu.dot_dimension_numbers<[1], [0], [0], [1], [0, 0, 1, 1], [], []>} : vector<16x8xf32>, vector<8x512xf32>, vector<16x512xf32> -> vector<16x512xf32>
    %c40 = arith.constant 40 : index
    %c0_11 = arith.constant 0 : index
    %27 = vector.load %arg1[%c40, %c0_11] : memref<72x128xf32, #tpu.memory_space<vmem>>, vector<16x8xf32>
    %cst_12 = arith.constant dense<0.000000e+00> : vector<16x512xf32>
    %28 = tpu.matmul %27, %23, %cst_12 {dimension_numbers = #tpu.dot_dimension_numbers<[1], [0], [0], [1], [0, 0, 1, 1], [], []>} : vector<16x8xf32>, vector<8x512xf32>, vector<16x512xf32> -> vector<16x512xf32>
    %29 = arith.addf %26, %28 : vector<16x512xf32>
    %c56 = arith.constant 56 : index
    %c0_13 = arith.constant 0 : index
    %30 = vector.load %arg1[%c56, %c0_13] : memref<72x128xf32, #tpu.memory_space<vmem>>, vector<16x1xf32>
    %c56_14 = arith.constant 56 : index
    %c1_15 = arith.constant 1 : index
    %31 = vector.load %arg1[%c56_14, %c1_15] : memref<72x128xf32, #tpu.memory_space<vmem>>, vector<16x1xf32>
    %32 = vector.broadcast %30 : vector<16x1xf32> to vector<16x512xf32>
    %33 = arith.mulf %29, %32 : vector<16x512xf32>
    %34 = vector.broadcast %31 : vector<16x1xf32> to vector<16x512xf32>
    %35 = arith.addf %33, %34 : vector<16x512xf32>
    %cst_16 = arith.constant 0.000000e+00 : f32
    %36 = vector.broadcast %cst_16 : f32 to vector<16x512xf32>
    %37 = arith.maximumf %35, %36 : vector<16x512xf32>
    %c53_i32 = arith.constant 53 : i32
    %38 = vector.broadcast %c53_i32 : i32 to vector<1x512xi32>
    %39 = arith.cmpi slt, %2, %38 : vector<1x512xi32>
    %cst_17 = arith.constant 0.000000e+00 : f32
    %40 = vector.shape_cast %39 : vector<1x512xi1> to vector<1x512xi1>
    %41 = vector.broadcast %40 : vector<1x512xi1> to vector<16x512xi1>
    %42 = vector.broadcast %cst_17 : f32 to vector<16x512xf32>
    %43 = arith.select %41, %37, %42 : vector<16x512xi1>, vector<16x512xf32>
    %c0_18 = arith.constant 0 : index
    %c0_19 = arith.constant 0 : index
    %44 = vector.load %arg2[%c0_18, %c0_19] : memref<16x512xf32, #tpu.memory_space<vmem>>, vector<16x512xf32>
    tpu.vector_store %arg2[%c0_18, %c0_19], %43 {strides = array<i32>} : memref<16x512xf32, #tpu.memory_space<vmem>>, vector<16x512xf32>,
    return
  }
}

</mosaic_0001>

<bundles_post_ra>
// kernel: tcn_forward.1
= control target key start
LH: loop header
LB: loop body
LE: loop exit
PB: predicated region body
PF: predicated region fallthrough
CT: control target
= control target key end

     0   :  { %s582_s15 = smov 1   ;;  %vm39_vm0 = vcmask 64512   ;;  %v583_v7 = vmov 0   ;;  %v584_v8 = vmov 1   ;;  %v11_v9 = vlaneseq  ;;  %s585_s23 = smov 2   ;;  %s758_s0 = inlined_call_operand.vmem [shape: f32[8,512], index: 0, kind: input, shape index: {}]   ;;  %s759_s1 = inlined_call_operand.vmem [shape: f32[72,128], index: 1, kind: input, shape index: {}]   ;;  %s760_s2 = inlined_call_operand.vmem [shape: f32[16,512], index: 2, kind: output, shape index: {}]  }
   0x1   :  { %v21_v0 = vld [vmem:[%s758_s0 + $0x8] sm:$0xff]  ;;  %v22_v1 = vld [vmem:[%s758_s0 + $0x10] sm:$0xff]  ;;  %v20_v2 = vld [vmem:[%s758_s0] sm:$0xff]  ;;  %570 = vset.pattern.permute.xlu1 %v583_v7  ;;  %571 = vset.pattern.permute.xlu2 %v584_v8 }
   0x2   :  { %v565_v3 = vpack.i.bf16 %v22_v1, %v21_v0  ;;  %24 = vrot.lane.b32.xlu1 %v20_v2, %s582_s15  ;;  %v23_v4 = vld [vmem:[%s758_s0 + $0x18] sm:$0xff]  ;;  %98 = vmatpush.msra.mxu2 %v22_v1  ;;  %v38_v5 = vld [vmem:[%s759_s1 + $0x8] sm:$0xff]  ;;  %v206_v6 = vld [vmem:[%s759_s1 + $0x10] sm:$0xff]  ;;  %v625_v10 = vand.u32 127, %v11_v9 }
   0x3   :  { %118 = vmatpush.msra.mxu3 %v23_v4  ;;  %58 = vmatpush.msra.mxu0 %v20_v2  ;;  %v37_v15 = vld [vmem:[%s759_s1] sm:$0xff]  ;;  %v259_v59 = vld [vmem:[%s759_s1 + $0x28] sm:$0xff]  ;;  %v260_v60 = vld [vmem:[%s759_s1 + $0x30] sm:$0xff] }
   0x4   :  { %566 = vrot.lane.b32.xlu0 %v565_v3, %s582_s15  ;;  %78 = vmatpush.msra.mxu1 %v21_v0  ;;  %vm32_vm1 = vcmp.lt.s32.totalorder %v625_v10, 1  ;;  %v636_v24 = vadd.s32 128, %v625_v10  ;;  %v640_v32 = vadd.s32 256, %v625_v10  ;;  %v652_v43 = vadd.s32 384, %v625_v10  ;;  %v257_v0 = vld [vmem:[%s759_s1 + $0x18] sm:$0xff]  ;;  %v458_v3 = vld [vmem:[%s759_s1 + $0x40] sm:$0xff] }
   0x5   :  { %533 = vmatmul.msk.f32.vlgmr.msra.gmra.mxu0 %vm39_vm0, %v38_v5  ;;  %535 = vmatmul.msk.f32.vlgmr.msra.gmra.mxu2 %vm39_vm0, %v38_v5  ;;  %vm228_vm3 = vcmp.lt.s32.totalorder %v625_v10, 51  ;;  %vm252_vm6 = vcmp.lt.s32.totalorder %v625_v10, 2  ;;  %v457_v2 = vld [vmem:[%s759_s1 + $0x38] sm:$0xff]  ;;  %vm501_vm9 = vcmp.lt.s32.totalorder %v625_v10, 53 }
   0x6   :  { %536 = vmatmul.msk.f32.vlgmr.msra.gmra.mxu3 %vm39_vm0, %v38_v5  ;;  %534 = vmatmul.msk.f32.vlgmr.msra.gmra.mxu1 %vm39_vm0, %v38_v5  ;;  %v17_v29 = vand.u32 127, %v636_v24  ;;  %v18_v40 = vand.u32 127, %v640_v32  ;;  %v19_v51 = vand.u32 127, %v652_v43 }
   0x7   :  { %217 = vperm.xlu2 %571, %v206_v6   ;;  %578 = vset.pattern.permute.xlu0 %v583_v7 }
   0x8   :  { %vm644_vm2 = vcmp.lt.s32.totalorder %v17_v29, 51  ;;  %vm230_vm4 = vcmp.lt.s32.totalorder %v18_v40, 51  ;;  %vm231_vm5 = vcmp.lt.s32.totalorder %v19_v51, 51  ;;  %vm709_vm7 = vcmp.lt.s32.totalorder %v18_v40, 53 }
   0x9   :  { %vm725_vm8 = vcmp.lt.s32.totalorder %v17_v29, 53  ;;  %vm504_vm10 = vcmp.lt.s32.totalorder %v19_v51, 53 }
   0xa   :  { %209 = vperm.xlu1 %570, %v206_v6  }
   0xc   :  { %30 = vrot.lane.b32.xlu0 %v23_v4, %s582_s15  ;;  %v258_v4 = vld [vmem:[%s759_s1 + $0x20] sm:$0xff] }
   0xf   :  { %577 = vset.pattern.permute.xlu2 %v583_v7 }
  0x12   :  { %579 = vset.pattern.permute.xlu1 %v584_v8 }
  0x61   :  { %v218_v31 = vpop.permute.xlu2 %217 }
  0x74   :  { %v25_v12 = vpop.permute.xlu1 %24 }
  0x76   :  { %v567_v11 = vpop.permute.xlu0 %566 }
  0x77   :  { %v569_v13 = vunpack.i.h.bf16 %v567_v11  ;;  %v568_v14 = vunpack.i.l.bf16 %v567_v11 }
  0x79   :  { %v35_v16 = vsel %vm32_vm1, %v25_v12, %v568_v14  ;;  %v34_v17 = vsel %vm32_vm1, %v568_v14, %v569_v13 }
  0x7a   :  { %161 = vmatpush.msrb.mxu1 %v35_v16  ;;  %181 = vmatpush.msrb.mxu2 %v34_v17 }
  0x7b   :  { %539 = vmatmul.msk.f32.vlgmr.msrb.gmra.mxu2 %vm39_vm0, %v37_v15  ;;  %538 = vmatmul.msk.f32.vlgmr.msrb.gmra.mxu1 %vm39_vm0, %v37_v15 }
  0x7c   :  { %v210_v28 = vpop.permute.xlu1 %209 }
  0x7e   :  { %v31_v18 = vpop.permute.xlu0 %30 }
  0x7f   :  { %v36_v19 = vsel %vm32_vm1, %v31_v18, %v25_v12  ;;  %v33_v20 = vsel %vm32_vm1, %v569_v13, %v31_v18 }
  0x80   :  { %141 = vmatpush.msrb.mxu0 %v36_v19  ;;  %201 = vmatpush.msrb.mxu3 %v33_v20 }
  0x81   :  { %537 = vmatmul.msk.f32.vlgmr.msrb.gmra.mxu0 %vm39_vm0, %v37_v15  ;;  %540 = vmatmul.msk.f32.vlgmr.msrb.gmra.mxu3 %vm39_vm0, %v37_v15 }
  0x82   :  { %v60_v22 = vpop.f32.mrf.mxu0 }
  0x83   :  { %v80_v21 = vpop.f32.mrf.mxu1 }
  0x88   :  { %v100_v23 = vpop.f32.mrf.mxu2 }
  0x89   :  { %v120_v27 = vpop.f32.mrf.mxu3 }
  0xf8   :  { %v163_v25 = vpop.f32.mrf.mxu1 }
  0xf9   :  { %v164_v26 = vadd.f32 %v163_v25, %v80_v21 }
  0xfb   :  { %v213_v30 = vmul.f32 %v210_v28, %v164_v26 }
  0xfd   :  { %v221_v33 = vadd.f32 %v218_v31, %v213_v30 }
  0xfe   :  { %v143_v34 = vpop.f32.mrf.mxu0  ;;  %v183_v35 = vpop.f32.mrf.mxu2 }
  0xff   :  { %v144_v37 = vadd.f32 %v143_v34, %v60_v22  ;;  %v225_v38 = vmax.f32 %v221_v33, 0.0  ;;  %v184_v39 = vadd.f32 %v183_v35, %v100_v23 }
 0x101   :  { %v212_v41 = vmul.f32 %v210_v28, %v144_v37  ;;  %v214_v42 = vmul.f32 %v210_v28, %v184_v39  ;;  %544 = vmatpush.msk.msra.mxu1 %vm644_vm2, %v225_v38  ;;  %v241_v50 = vsel %vm644_vm2, %v225_v38, 0.0 }
 0x102   :  { %545 = vmatmul.msk.f32.vlgmr.msra.gmra.mxu1 %vm39_vm0, %v259_v59 }
 0x103   :  { %v222_v44 = vadd.f32 %v218_v31, %v214_v42  ;;  %v220_v45 = vadd.f32 %v218_v31, %v212_v41 }
 0x104   :  { %v203_v46 = vpop.f32.mrf.mxu3 }
 0x105   :  { %v226_v47 = vmax.f32 %v222_v44, 0.0  ;;  %v204_v48 = vadd.f32 %v203_v46, %v120_v27  ;;  %v224_v49 = vmax.f32 %v220_v45, 0.0 }
 0x107   :  { %v215_v52 = vmul.f32 %v210_v28, %v204_v48  ;;  %v240_v53 = vsel %vm228_vm3, %v224_v49, 0.0  ;;  %541 = vmatpush.msk.msra.mxu0 %vm228_vm3, %v224_v49  ;;  %547 = vmatpush.msk.msra.mxu2 %vm230_vm4, %v226_v47  ;;  %v242_v54 = vsel %vm230_vm4, %v226_v47, 0.0 }
 0x108   :  { %244 = vrot.lane.b32.xlu1 %v240_v53, %s585_s23  ;;  %v572_v55 = vpack.i.bf16 %v242_v54, %v241_v50  ;;  %548 = vmatmul.msk.f32.vlgmr.msra.gmra.mxu2 %vm39_vm0, %v259_v59 }
 0x109   :  { %v223_v56 = vadd.f32 %v218_v31, %v215_v52  ;;  %542 = vmatmul.msk.f32.vlgmr.msra.gmra.mxu0 %vm39_vm0, %v259_v59 }
 0x10a   :  { %573 = vrot.lane.b32.xlu2 %v572_v55, %s585_s23  ;;  %546 = vmatmul.msk.f32.gmra.mxu1 %vm39_vm0, %v260_v60 }
 0x10b   :  { %v227_v57 = vmax.f32 %v223_v56, 0.0 }
 0x10d   :  { %550 = vmatpush.msk.msra.mxu3 %vm231_vm5, %v227_v57  ;;  %v243_v58 = vsel %vm231_vm5, %v227_v57, 0.0 }
 0x10e   :  { %250 = vrot.lane.b32.xlu0 %v243_v58, %s585_s23  ;;  %551 = vmatmul.msk.f32.vlgmr.msra.gmra.mxu3 %vm39_vm0, %v259_v59 }
 0x110   :  { %549 = vmatmul.msk.f32.gmra.mxu2 %vm39_vm0, %v260_v60  ;;  %478 = vperm.xlu1 %579, %v457_v2  }
 0x111   :  { %543 = vmatmul.msk.f32.gmra.mxu0 %vm39_vm0, %v260_v60 }
 0x112   :  { %461 = vperm.xlu2 %577, %v457_v2  }
 0x116   :  { %552 = vmatmul.msk.f32.gmra.mxu3 %vm39_vm0, %v260_v60  ;;  %466 = vperm.xlu0 %578, %v458_v3  }
 0x11a   :  { %580 = vset.pattern.permute.xlu2 %v584_v8 }
 0x11b   :  { %482 = vperm.xlu2 %580, %v458_v3  }
 0x11e   :  { %581 = vset.pattern.permute.xlu0 %v584_v8 }
 0x164   :  { %v574_v61 = vpop.permute.xlu2 %573 }
 0x165   :  { %v576_v62 = vunpack.i.h.bf16 %v574_v61  ;;  %v575_v63 = vunpack.i.l.bf16 %v574_v61 }
 0x167   :  { %v254_v1 = vsel %vm252_vm6, %v575_v63, %v576_v62 }
 0x168   :  { %426 = vmatpush.msrb.mxu2 %v254_v1 }
 0x169   :  { %557 = vmatmul.msk.f32.vlgmr.msrb.gmra.mxu2 %vm39_vm0, %v257_v0 }
 0x16c   :  { %v462_v16 = vpop.permute.xlu2 %461 }
 0x171   :  { %558 = vmatmul.msk.f32.gmra.mxu2 %vm39_vm0, %v258_v4 }
 0x175   :  { %v483_v33 = vpop.permute.xlu2 %482 }
 0x17a   :  { %v245_v5 = vpop.permute.xlu1 %244 }
 0x17b   :  { %v255_v6 = vsel %vm252_vm6, %v245_v5, %v575_v63 }
 0x17c   :  { %403 = vmatpush.msrb.mxu1 %v255_v6 }
 0x17d   :  { %555 = vmatmul.msk.f32.vlgmr.msrb.gmra.mxu1 %vm39_vm0, %v257_v0 }
 0x17f   :  { %v307_v13 = vpop.f32.mrf.mxu1 }
 0x180   :  { %v251_v7 = vpop.permute.xlu0 %250 }
 0x181   :  { %v253_v9 = vsel %vm252_vm6, %v576_v62, %v251_v7  ;;  %v256_v11 = vsel %vm252_vm6, %v251_v7, %v245_v5 }
 0x182   :  { %380 = vmatpush.msrb.mxu0 %v256_v11  ;;  %449 = vmatpush.msrb.mxu3 %v253_v9  ;;  %v479_v18 = vpop.permute.xlu1 %478 }
 0x183   :  { %559 = vmatmul.msk.f32.vlgmr.msrb.gmra.mxu3 %vm39_vm0, %v257_v0  ;;  %553 = vmatmul.msk.f32.vlgmr.msrb.gmra.mxu0 %vm39_vm0, %v257_v0 }
 0x185   :  { %556 = vmatmul.msk.f32.gmra.mxu1 %vm39_vm0, %v258_v4 }
 0x186   :  { %v284_v14 = vpop.f32.mrf.mxu0 }
 0x187   :  { %v310_v20 = vpop.f32.mrf.mxu1 }
 0x188   :  { %v467_v27 = vpop.permute.xlu0 %466 }
 0x18b   :  { %560 = vmatmul.msk.f32.gmra.mxu3 %vm39_vm0, %v258_v4  ;;  %554 = vmatmul.msk.f32.gmra.mxu0 %vm39_vm0, %v258_v4  ;;  %v330_v8 = vpop.f32.mrf.mxu2 }
 0x18e   :  { %v287_v31 = vpop.f32.mrf.mxu0 }
 0x191   :  { %v353_v22 = vpop.f32.mrf.mxu3 }
 0x193   :  { %v333_v12 = vpop.f32.mrf.mxu2 }
 0x199   :  { %v356_v38 = vpop.f32.mrf.mxu3 }
 0x1ec   :  { %v428_v15 = vpop.f32.mrf.mxu2 }
 0x1ed   :  { %v429_v17 = vadd.f32 %v428_v15, %v330_v8 }
 0x1ef   :  { %v471_v19 = vmul.f32 %v462_v16, %v429_v17 }
 0x1f1   :  { %v487_v21 = vadd.f32 %v479_v18, %v471_v19 }
 0x1f3   :  { %v495_v25 = vmax.f32 %v487_v21, 0.0 }
 0x1f4   :  { %v431_v26 = vpop.f32.mrf.mxu2 }
 0x1f5   :  { %v515_v28 = vsel %vm709_vm7, %v495_v25, 0.0  ;;  %v432_v30 = vadd.f32 %v431_v26, %v333_v12 }
 0x1f6   :  { %523 = vst [vmem:[%s760_s2 + $0x10] sm:$0xff] %v515_v28 }
 0x1f7   :  { %v475_v34 = vmul.f32 %v467_v27, %v432_v30 }
 0x1f9   :  { %v491_v35 = vadd.f32 %v483_v33, %v475_v34 }
 0x1fa   :  { %v405_v32 = vpop.f32.mrf.mxu1 }
 0x1fb   :  { %v406_v36 = vadd.f32 %v405_v32, %v307_v13  ;;  %v499_v37 = vmax.f32 %v491_v35, 0.0 }
 0x1fd   :  { %v470_v39 = vmul.f32 %v462_v16, %v406_v36  ;;  %v519_v40 = vsel %vm709_vm7, %v499_v37, 0.0 }
 0x1fe   :  { %527 = vst [vmem:[%s760_s2 + $0x30] sm:$0xff] %v519_v40 }
 0x1ff   :  { %v486_v41 = vadd.f32 %v479_v18, %v470_v39 }
 0x200   :  { %v382_v42 = vpop.f32.mrf.mxu0 }
 0x201   :  { %v383_v45 = vadd.f32 %v382_v42, %v284_v14  ;;  %v494_v46 = vmax.f32 %v486_v41, 0.0 }
 0x202   :  { %v408_v47 = vpop.f32.mrf.mxu1 }
 0x203   :  { %v469_v48 = vmul.f32 %v462_v16, %v383_v45  ;;  %v514_v49 = vsel %vm725_vm8, %v494_v46, 0.0  ;;  %v409_v50 = vadd.f32 %v408_v47, %v310_v20 }
 0x204   :  { %522 = vst [vmem:[%s760_s2 + $0x8] sm:$0xff] %v514_v49 }
 0x205   :  { %v485_v52 = vadd.f32 %v479_v18, %v469_v48  ;;  %v474_v53 = vmul.f32 %v467_v27, %v409_v50 }
 0x206   :  { %v451_v54 = vpop.f32.mrf.mxu3 }
 0x207   :  { %v452_v24 = vadd.f32 %v451_v54, %v353_v22  ;;  %v493_v29 = vmax.f32 %v485_v52, 0.0  ;;  %v490_v55 = vadd.f32 %v483_v33, %v474_v53 }
 0x208   :  { %v385_v56 = vpop.f32.mrf.mxu0 }
 0x209   :  { %v472_v57 = vmul.f32 %v462_v16, %v452_v24  ;;  %v513_v58 = vsel %vm501_vm9, %v493_v29, 0.0  ;;  %v386_v59 = vadd.f32 %v385_v56, %v287_v31  ;;  %v498_v60 = vmax.f32 %v490_v55, 0.0 }
 0x20a   :  { %521 = vst [vmem:[%s760_s2] sm:$0xff] %v513_v58 }
 0x20b   :  { %v488_v61 = vadd.f32 %v479_v18, %v472_v57  ;;  %v473_v62 = vmul.f32 %v467_v27, %v386_v59  ;;  %v518_v63 = vsel %vm725_vm8, %v498_v60, 0.0 }
 0x20c   :  { %526 = vst [vmem:[%s760_s2 + $0x28] sm:$0xff] %v518_v63 }
 0x20d   :  { %v496_v0 = vmax.f32 %v488_v61, 0.0  ;;  %v489_v1 = vadd.f32 %v483_v33, %v473_v62 }
 0x20e   :  { %v454_v2 = vpop.f32.mrf.mxu3 }
 0x20f   :  { %v516_v3 = vsel %vm504_vm10, %v496_v0, 0.0  ;;  %v455_v4 = vadd.f32 %v454_v2, %v356_v38  ;;  %v497_v5 = vmax.f32 %v489_v1, 0.0 }
 0x210   :  { %524 = vst [vmem:[%s760_s2 + $0x18] sm:$0xff] %v516_v3 }
 0x211   :  { %v476_v6 = vmul.f32 %v467_v27, %v455_v4  ;;  %v517_v7 = vsel %vm501_vm9, %v497_v5, 0.0 }
 0x212   :  { %525 = vst [vmem:[%s760_s2 + $0x20] sm:$0xff] %v517_v7 }
 0x213   :  { %v492_v43 = vadd.f32 %v483_v33, %v476_v6 }
 0x215   :  { %v500_v51 = vmax.f32 %v492_v43, 0.0 }
 0x217   :  { %v520_v9 = vsel %vm504_vm10, %v500_v51, 0.0 }
 0x218   :  { %528 = vst [vmem:[%s760_s2 + $0x38] sm:$0xff] %v520_v9 }

</bundles_post_ra>
